<compile_context>
chip_gen: v5e
topology: v5e:2x2
jax: 0.10.0
libtpu: 0.0.40
codegen_flags: <defaults>
</compile_context>

<pallas_src>
import math

import jax
import jax.numpy as jnp
import numpy as np
from jax.experimental import pallas as pl
from jax.experimental.pallas import tpu as pltpu


# ---------------------------------------------------------------------------
# Pallas kernel: conv-as-matmul + bias + InstanceNorm [+ ReLU] [+ residual]
# ---------------------------------------------------------------------------
def _conv_in_kernel_factory(apply_relu: bool, add_residual: bool, eps: float):
    def kernel(wm_ref, b_ref, xcol_ref, *rest):
        if add_residual:
            res_ref, o_ref = rest
        else:
            (o_ref,) = rest

        # Convolution as one fat matmul on the MXU, f32 accumulation.
        y = jnp.dot(wm_ref[...], xcol_ref[...],
                    preferred_element_type=jnp.float32)          # (C, HW)
        y = y + b_ref[...].astype(jnp.float32)                   # (C, 1) bias

        # InstanceNorm2d (no affine, biased variance, eps) over the spatial axis.
        mean = jnp.mean(y, axis=-1, keepdims=True)
        yc = y - mean
        var = jnp.mean(yc * yc, axis=-1, keepdims=True)
        y = yc * jax.lax.rsqrt(var + eps)

        if apply_relu:
            y = jnp.maximum(y, 0.0)
        if add_residual:
            y = y + res_ref[...].astype(jnp.float32)

        o_ref[...] = y.astype(o_ref.dtype)

    return kernel


def _conv_in_layer(xcol, wm, b, residual=None, *, apply_relu, eps, out_dtype):
    """One (conv + InstanceNorm [+ ReLU] [+ residual]) layer via pallas_call.

    xcol:     (N, K, HW)  im2col columns (K = k*k*C)
    wm:       (C, K)      conv weight matrix (rows = output channels)
    b:        (C, 1)      conv bias
    residual: (N, C, HW)  optional residual added after the norm
    """
    N, K, HW = xcol.shape
    C = wm.shape[0]

    kernel = _conv_in_kernel_factory(apply_relu, residual is not None, eps)

    in_specs = [
        pl.BlockSpec((C, K), lambda i: (0, 0)),             # weights (shared)
        pl.BlockSpec((C, 1), lambda i: (0, 0)),             # bias (shared)
        pl.BlockSpec((None, K, HW), lambda i: (i, 0, 0)),   # one sample's columns
    ]
    args = [wm, b, xcol]
    if residual is not None:
        in_specs.append(pl.BlockSpec((None, C, HW), lambda i: (i, 0, 0)))
        args.append(residual)

    return pl.pallas_call(
        kernel,
        out_shape=jax.ShapeDtypeStruct((N, C, HW), out_dtype),
        grid_spec=pltpu.PrefetchScalarGridSpec(
            num_scalar_prefetch=0,
            grid=(N,),
            in_specs=in_specs,
            out_specs=pl.BlockSpec((None, C, HW), lambda i: (i, 0, 0)),
        ),
        compiler_params=pltpu.CompilerParams(
            dimension_semantics=("parallel",)),
    )(*args)


# ---------------------------------------------------------------------------
# Wrapper-side data movement (zero-FLOP glue): reflection pad + im2col
# ---------------------------------------------------------------------------
def _reflection_pad_nchw(x, pad):
    return jnp.pad(x, ((0, 0), (0, 0), (pad, pad), (pad, pad)), mode="reflect")


def _im2col_nchw(xpad, kernel_size, stride):
    """xpad: (N, C, Hp, Wp) -> (N, k*k*C, Ho*Wo); row index = (dh*k+dw)*C + c."""
    N, C, Hp, Wp = xpad.shape
    k = kernel_size
    Ho = (Hp - k) // stride + 1
    Wo = (Wp - k) // stride + 1
    cols = []
    for dh in range(k):
        for dw in range(k):
            patch = xpad[:, :, dh:dh + stride * Ho:stride,
                         dw:dw + stride * Wo:stride]
            cols.append(patch.reshape(N, C, Ho * Wo))
    return jnp.concatenate(cols, axis=1), Ho, Wo


# ---------------------------------------------------------------------------
# ResBlock module
# ---------------------------------------------------------------------------
class ResBlock:
    """JAX/Pallas equivalent of networks.blocks.ResBlock (forward pass only)."""

    def __init__(self, dim, kernel_size=3, stride=1, padding=1, *, key=None,
                 dtype=jnp.float32, eps=1e-5):
        # TODO(synk): only the size-preserving config (stride=1, k = 2*padding+1)
        # is supported; other configs break the residual add in PyTorch too.
        assert stride == 1 and kernel_size == 2 * padding + 1, (
            "ResBlock requires the convs to preserve the spatial size")
        self.dim = dim
        self.kernel_size = kernel_size
        self.stride = stride
        self.padding = padding
        self.eps = eps

        if key is None:
            key = jax.random.PRNGKey(0)
        k1, k2, k3, k4 = jax.random.split(key, 4)
        fan_in = dim * kernel_size * kernel_size
        bound = 1.0 / math.sqrt(fan_in)
        w_shape = (dim, dim, kernel_size, kernel_size)
        self.w1 = jax.random.uniform(k1, w_shape, dtype, -bound, bound)
        self.b1 = jax.random.uniform(k2, (dim,), dtype, -bound, bound)
        self.w2 = jax.random.uniform(k3, w_shape, dtype, -bound, bound)
        self.b2 = jax.random.uniform(k4, (dim,), dtype, -bound, bound)

    def __call__(self, x):
        N, C, H, W = x.shape
        assert C == self.dim, (C, self.dim)
        k, p, s, eps = self.kernel_size, self.padding, self.stride, self.eps

        # (C_out, C_in, kh, kw) -> (C_out, k*k*C_in), matching im2col row order.
        wm1 = self.w1.transpose(0, 2, 3, 1).reshape(C, k * k * C)
        wm2 = self.w2.transpose(0, 2, 3, 1).reshape(C, k * k * C)
        b1 = self.b1.reshape(C, 1)
        b2 = self.b2.reshape(C, 1)

        # Layer 1: reflection pad -> conv -> InstanceNorm -> ReLU  (fused kernel)
        xcol1, Ho, Wo = _im2col_nchw(_reflection_pad_nchw(x, p), k, s)
        h = _conv_in_layer(xcol1, wm1, b1, apply_relu=True, eps=eps,
                           out_dtype=x.dtype)                     # (N, C, H*W)
        h = h.reshape(N, C, Ho, Wo)

        # Layer 2: reflection pad -> conv -> InstanceNorm -> +residual (fused)
        xcol2, _, _ = _im2col_nchw(_reflection_pad_nchw(h, p), k, 1)
        res = x.reshape(N, C, H * W)
        out = _conv_in_layer(xcol2, wm2, b2, residual=res, apply_relu=False,
                             eps=eps, out_dtype=x.dtype)
        return out.reshape(N, C, H, W)


# ---------------------------------------------------------------------------
# Pure-JAX reference for correctness checking
# ---------------------------------------------------------------------------
def _resblock_ref(x, w1, b1, w2, b2, eps=1e-5):
    def conv(h, w, b):
        hp = jnp.pad(h, ((0, 0), (0, 0), (1, 1), (1, 1)), mode="reflect")
        y = jax.lax.conv_general_dilated(
            hp, w, window_strides=(1, 1), padding="VALID",
            dimension_numbers=("NCHW", "OIHW", "NCHW"))
        return y + b[None, :, None, None]

    def inorm(h):
        m = jnp.mean(h, axis=(2, 3), keepdims=True)
        v = jnp.mean((h - m) ** 2, axis=(2, 3), keepdims=True)
        return (h - m) * jax.lax.rsqrt(v + eps)

    h = jax.nn.relu(inorm(conv(x, w1, b1)))
    h = inorm(conv(h, w2, b2))
    return h + x


if __name__ == "__main__":
    key = jax.random.PRNGKey(0)
    kx, kp = jax.random.split(key)
    N, C, H, W = 2, 4, 16, 16
    x = jax.random.normal(kx, (N, C, H, W), dtype=jnp.float32)

    block = ResBlock(dim=C, kernel_size=3, stride=1, padding=1, key=kp)
    y = jax.block_until_ready(block(x))

    ref = _resblock_ref(x, block.w1, block.b1, block.w2, block.b2)
    assert y.shape == x.shape, y.shape
    np.testing.assert_allclose(np.asarray(y), np.asarray(ref),
                               rtol=1e-4, atol=1e-4)

    print("KERNEL_OK")
</pallas_src>

<mosaic_0001>
module attributes {stable_mosaic.version = 11 : i64} {
  func.func @kernel(%arg0: i32, %arg1: memref<4x36xf32, #tpu.memory_space<vmem>>, %arg2: memref<4x1xf32, #tpu.memory_space<vmem>>, %arg3: memref<1x36x256xf32, #tpu.memory_space<vmem>>, %arg4: memref<1x4x256xf32, #tpu.memory_space<vmem>>) attributes {dimension_semantics = [#tpu.dimension_semantics<parallel>], iteration_bounds = array<i64: 2>, scalar_prefetch = 0 : i64, scratch_operands = 0 : i64, tpu.core_type = #tpu.core_type<tc>, window_params = [{pipeline_mode = #tpu.pipeline_mode<synchronous>, transform_indices = @transform_0, window_bounds = array<i64: 4, 36>}, {pipeline_mode = #tpu.pipeline_mode<synchronous>, transform_indices = @transform_1, window_bounds = array<i64: 4, 1>}, {transform_indices = @transform_2, window_bounds = array<i64: 1, 36, 256>}, {transform_indices = @transform_3, window_bounds = array<i64: 1, 4, 256>}]} {
    %c0 = arith.constant 0 : index
    %c0_0 = arith.constant 0 : index
    %0 = vector.load %arg1[%c0, %c0_0] : memref<4x36xf32, #tpu.memory_space<vmem>>, vector<4x36xf32>
    %c0_1 = arith.constant 0 : index
    %c0_2 = arith.constant 0 : index
    %c0_3 = arith.constant 0 : index
    %1 = vector.load %arg3[%c0_1, %c0_2, %c0_3] : memref<1x36x256xf32, #tpu.memory_space<vmem>>, vector<1x36x256xf32>
    %2 = vector.shape_cast %1 : vector<1x36x256xf32> to vector<36x256xf32>
    %cst = arith.constant dense<0.000000e+00> : vector<4x256xf32>
    %3 = tpu.matmul %0, %2, %cst {dimension_numbers = #tpu.dot_dimension_numbers<[1], [0], [0], [1], [0, 0, 1, 1], [], []>} : vector<4x36xf32>, vector<36x256xf32>, vector<4x256xf32> -> vector<4x256xf32>
    %c0_4 = arith.constant 0 : index
    %c0_5 = arith.constant 0 : index
    %4 = vector.load %arg2[%c0_4, %c0_5] : memref<4x1xf32, #tpu.memory_space<vmem>>, vector<4x1xf32>
    %5 = vector.broadcast %4 : vector<4x1xf32> to vector<4x256xf32>
    %6 = arith.addf %3, %5 : vector<4x256xf32>
    %cst_6 = arith.constant dense<0.000000e+00> : vector<4xf32>
    %7 = vector.multi_reduction <add>, %6, %cst_6 [1] : vector<4x256xf32> to vector<4xf32>
    %8 = vector.shape_cast %7 : vector<4xf32> to vector<4x1xf32>
    %cst_7 = arith.constant 2.560000e+02 : f32
    %9 = vector.broadcast %cst_7 : f32 to vector<4x1xf32>
    %10 = arith.divf %8, %9 : vector<4x1xf32>
    %11 = vector.broadcast %10 : vector<4x1xf32> to vector<4x256xf32>
    %12 = arith.subf %6, %11 : vector<4x256xf32>
    %13 = arith.mulf %12, %12 : vector<4x256xf32>
    %cst_8 = arith.constant dense<0.000000e+00> : vector<4xf32>
    %14 = vector.multi_reduction <add>, %13, %cst_8 [1] : vector<4x256xf32> to vector<4xf32>
    %15 = vector.shape_cast %14 : vector<4xf32> to vector<4x1xf32>
    %cst_9 = arith.constant 2.560000e+02 : f32
    %16 = vector.broadcast %cst_9 : f32 to vector<4x1xf32>
    %17 = arith.divf %15, %16 : vector<4x1xf32>
    %cst_10 = arith.constant 9.99999974E-6 : f32
    %18 = vector.broadcast %cst_10 : f32 to vector<4x1xf32>
    %19 = arith.addf %17, %18 : vector<4x1xf32>
    %20 = math.rsqrt %19 : vector<4x1xf32>
    %21 = vector.broadcast %20 : vector<4x1xf32> to vector<4x256xf32>
    %22 = arith.mulf %12, %21 : vector<4x256xf32>
    %cst_11 = arith.constant 0.000000e+00 : f32
    %23 = vector.broadcast %cst_11 : f32 to vector<4x256xf32>
    %24 = arith.maximumf %22, %23 : vector<4x256xf32>
    %c0_12 = arith.constant 0 : index
    %c0_13 = arith.constant 0 : index
    %c0_14 = arith.constant 0 : index
    %25 = vector.load %arg4[%c0_12, %c0_13, %c0_14] : memref<1x4x256xf32, #tpu.memory_space<vmem>>, vector<1x4x256xf32>
    %26 = vector.shape_cast %25 : vector<1x4x256xf32> to vector<4x256xf32>
    %27 = vector.shape_cast %24 : vector<4x256xf32> to vector<1x4x256xf32>
    tpu.vector_store %arg4[%c0_12, %c0_13, %c0_14], %27 {strides = array<i32>} : memref<1x4x256xf32, #tpu.memory_space<vmem>>, vector<1x4x256xf32>,
    return
  }
  func.func @transform_0(%arg0: i32) -> (i32, i32) {
    %c0_i32 = arith.constant 0 : i32
    %c0_i32_0 = arith.constant 0 : i32
    %c0_i32_1 = arith.constant 0 : i32
    return %c0_i32, %c0_i32_0 : i32, i32
  }
  func.func @transform_1(%arg0: i32) -> (i32, i32) {
    %c0_i32 = arith.constant 0 : i32
    %c0_i32_0 = arith.constant 0 : i32
    %c0_i32_1 = arith.constant 0 : i32
    return %c0_i32, %c0_i32_0 : i32, i32
  }
  func.func @transform_2(%arg0: i32) -> (i32, i32, i32) {
    %c0_i32 = arith.constant 0 : i32
    %c0_i32_0 = arith.constant 0 : i32
    %c0_i32_1 = arith.constant 0 : i32
    return %arg0, %c0_i32, %c0_i32_0 : i32, i32, i32
  }
  func.func @transform_3(%arg0: i32) -> (i32, i32, i32) {
    %c0_i32 = arith.constant 0 : i32
    %c0_i32_0 = arith.constant 0 : i32
    %c0_i32_1 = arith.constant 0 : i32
    return %arg0, %c0_i32, %c0_i32_0 : i32, i32, i32
  }
}

</mosaic_0001>

<bundles_post_ra>
// kernel: tpu_custom_call.1
= control target key start
LH: loop header
LB: loop body
LE: loop exit
PB: predicated region body
PF: predicated region fallthrough
CT: control target
= control target key end

     0   :  { %8 = vsyncpa [#allocation3], 0  ;;  %s604_s0 = inlined_call_operand.vmem [shape: f32[4,36], index: 0, kind: input, shape index: {}]   ;;  %s605_s1 = inlined_call_operand.vmem [shape: f32[4,1], index: 1, kind: input, shape index: {}]   ;;  %s606_s2 = inlined_call_operand.vmem [shape: f32[2,36,256], index: 2, kind: input, shape index: {}]   ;;  %s607_s3 = inlined_call_operand.hbm [shape: f32[2,4,256], index: 3, kind: output, shape index: {}]  }
   0x1   :  { %10 = vsyncpa [#allocation3 + $0x1], 0  ;;  %s506_s12 = smov 0   ;;  %s508_s13 = smov 0  }
   0x2   :  { %s510_s14 = smov 0   ;;  %s512_s15 = smov 0  }
   0x3 LB: > { %s527_s16 = sadd.s32 4294967295, %s482_s15   ;;  %s357_s17 = sadd.s32 4294967294, %s482_s15   ;;  %s482_s15 = sphi %s512_s15, %s613_s15   ;;  %s478_s14 = sphi %s510_s14, %s612_s14   ;;  %s474_s13 = sphi %s508_s13, %s611_s13   ;;  %s470_s12 = sphi %s506_s12, %s610_s12  }
   0x4   : > { %s531_s18 = sadd.s32 1, %s482_s15   ;;  %s91_s19 = sadd.s32 1, %s478_s14 }
   0x5   : > { %s88_s20 = ssub.s32 %s482_s15, %s531_s18  ;;  %p101_p0 = scmp.ne.s32.totalorder %s478_s14, %s474_s13 }
   0x6   : > { %p89_p1 = scmp.eq.s32.totalorder %s88_s20, 0  ;;  %p102_p2 = scmp.eq.s32.totalorder %s527_s16, 1 }
   0x7   : > { %p107_p3 = scmp.ne.s32.totalorder %s474_s13, %s470_s12  ;;  %p108_p4 = scmp.eq.s32.totalorder %s357_s17, 1 }
   0x8   : > { %s542_s21 = scalar_select %p89_p1, %s478_s14, %s91_s19  }
   0x9   : > { %p544_p5 = por %p102_p2, %p101_p0  ;;  %p548_p6 = por %p108_p4, %p107_p3 }
   0xa   : > { %p360_p7 = scmp.ge.s32.totalorder %s482_s15, 1  ;;  %p140_p8 = scmp.lt.s32.totalorder %s482_s15, 3 }
   0xc   : > { %p141_p9 = pnand %p360_p7, %p140_p8 }
   0xd   : > { %p164_p10 = scmp.lt.s32.totalorder (!%p141_p9), %s527_s16, 1  ;;  %s161_s6 = sand.u32 (!%p141_p9), 1, %s474_s13  }
   0xe   : > { %144 = sbr.rel (%p141_p9) target bundleno = 438 (0x1b6), region = 32  ;;  %s361_s7 = sshll.u32 (!%p141_p9), %s161_s6, 3 }
   0xf   : > { %s372_s8 = sshll.u32 (!%p141_p9), %s527_s16, 3  ;;  %s163_s17 = scalar_lea.vmem (!%p141_p9), [#allocation2], %s361_s7 }
  0x10   : > { %s293_s11 = scalar_lea.hbm (!%p141_p9), %s607_s3, %s372_s8  ;;  %s295_s19 = sshll.u32 (!%p141_p9), %s163_s17, 4  ;;  %s296_s19 = int_to_ptr.vmem [resolvable:$true] %s295_s19 }
  0x11   : > { %s297_s20 = sshll.u32 (!%p141_p9), %s293_s11, 4  ;;  %s440_s28 = scalar_lea.hbm (!%p141_p9), %s607_s3, 16  ;;  %s298_s20 = int_to_ptr.hbm [resolvable:$true] %s297_s20 }
  0x12   : > { %s434_s24 = sshra.s32 (!%p141_p9), %s298_s20, 4  ;;  %s435_s24 = int_to_ptr.hbm [resolvable:$true] %s434_s24 }
  0x13   : > { %v484_v0 = vmov 0   ;;  %v180_v1 = vld [vmem:[%s605_s1] sm:$0xf]  ;;  %s165_s26 = scalar_select %p164_p10, %s527_s16, 1  ;;  %vm190_vm0 = vcmask 1043456   ;;  %vm186_vm1 = vcmask 293888  }
  0x14   : > { %415 = vset.pattern.permute.xlu0 %v484_v0  ;;  %v169_v12 = vld [vmem:[%s604_s0] sm:$0xf]  ;;  %v485_v21 = vmov 256.0   ;;  %s282_s16 = scalar_lea.sflag [#allocation3], %s161_s6  ;;  %s436_s25 = scalar_lea.hbm %s435_s24, 8 }
  0x15   : > { %183 = vperm.xlu0 %415, %v180_v1   ;;  %s373_s27 = smul.u32 80, %s165_s26  ;;  %416 = vrcp.f32 %v485_v21  ;;  %p437_p11 = scmp.ne.s32.totalorder %s435_s24, %s436_s25 }
  0x16   : > { %p441_p0 = scmp.lt.s32.totalorder %s435_s24, %s607_s3  ;;  %p442_p1 = scmp.lt.s32.totalorder %s440_s28, %s436_s25 }
  0x17   : > { %s168_s30 = scalar_lea.vmem %s606_s2, %s373_s27  ;;  %p438_p12 = pnand %p437_p11, %p544_p5 }
  0x18   : > { %v178_v2 = vld [vmem:[%s168_s30 + $0x40] sm:$0xf]  ;;  %v179_v3 = vld [vmem:[%s168_s30 + $0x48] sm:$0xf]  ;;  %v176_v4 = vld [vmem:[%s168_s30 + $0x30] sm:$0xff]  ;;  %p443_p2 = por %p442_p1, %p441_p0 }
  0x19   : > { %363 = vmatpush.msk.msra.mxu0 %vm190_vm0, %v178_v2  ;;  %365 = vmatpush.msk.msra.mxu1 %vm190_vm0, %v179_v3  ;;  %v177_v5 = vld [vmem:[%s168_s30 + $0x38] sm:$0xff]  ;;  %v174_v6 = vld [vmem:[%s168_s30 + $0x20] sm:$0xff]  ;;  %v175_v7 = vld [vmem:[%s168_s30 + $0x28] sm:$0xff]  ;;  %p439_p13 = pneg %p438_p12 }
  0x1a   : > { %v172_v8 = vld [vmem:[%s168_s30 + $0x10] sm:$0xff]  ;;  %v173_v9 = vld [vmem:[%s168_s30 + $0x18] sm:$0xff]  ;;  %v170_v10 = vld [vmem:[%s168_s30] sm:$0xff] }
  0x1b   : > { %209 = vmatpush.msra.mxu0 %v176_v4  ;;  %229 = vmatpush.msra.mxu1 %v177_v5  ;;  %v171_v11 = vld [vmem:[%s168_s30 + $0x8] sm:$0xff]  ;;  %v417_v22 = vpop.eup %416  ;;  %p444_p3 = pnand %p443_p2, %p439_p13 }
  0x1c   : > { %v243_v23 = vmul.f32 256.0, %v417_v22  ;;  %vm247_vm2 = vweird.f32 %v417_v22 }
  0x1d   : > { %210 = vmatpush.msra.mxu0 %v174_v6  ;;  %230 = vmatpush.msra.mxu1 %v175_v7 }
  0x1e   : > { %v244_v24 = vsub.f32 1.0, %v243_v23 }
  0x1f   : > { %211 = vmatpush.msra.mxu0 %v172_v8  ;;  %231 = vmatpush.msra.mxu1 %v173_v9 }
  0x20   : > { %v245_v25 = vmul.f32 %v417_v22, %v244_v24 }
  0x21   : > { %212 = vmatpush.msra.mxu0 %v170_v10  ;;  %232 = vmatpush.msra.mxu1 %v171_v11 }
  0x22   : > { %364 = vmatmul.msk.f32.vlgmr.msra.gmra.mxu0 %vm186_vm1, %v169_v12  ;;  %366 = vmatmul.msk.f32.vlgmr.msra.gmra.mxu1 %vm186_vm1, %v169_v12  ;;  %v246_v26 = vadd.f32 %v417_v22, %v245_v25 }
  0x24   : > { %v248_v27 = vsel %vm247_vm2, %v417_v22, %v246_v26 }
  0x87   : > { %v184_v13 = vpop.permute.xlu0 %183 }
  0x9f   : > { %v214_v14 = vpop.f32.mrf.mxu0  ;;  %v234_v15 = vpop.f32.mrf.mxu1 }
  0xa0   : > { %v215_v16 = vadd.f32 %v214_v14, %v184_v13  ;;  %v235_v17 = vadd.f32 %v234_v15, %v184_v13 }
  0xa2   : > { %v237_v18 = vsel %vm190_vm0, %v215_v16, 0.0  ;;  %v238_v19 = vsel %vm190_vm0, %v235_v17, 0.0 }
  0xa3   : > { %v239_v20 = vadd.f32 %v238_v19, %v237_v18 }
  0xa5   : > { %240 = vadd.xlane.f32.xlu0 %v239_v20 }
 0x118   : > { %v241_v28 = vpop.xlane.xlu0 %240 }
 0x119   : > { %v249_v29 = vmul.f32 %v248_v27, %v241_v28 }
 0x11b   : > { %v250_v30 = vsub.f32 %v215_v16, %v249_v29  ;;  %v251_v31 = vsub.f32 %v235_v17, %v249_v29 }
 0x11d   : > { %v252_v32 = vmul.f32 %v250_v30, %v250_v30  ;;  %v253_v33 = vmul.f32 %v251_v31, %v251_v31 }
 0x11f   : > { %v254_v34 = vsel %vm190_vm0, %v252_v32, 0.0  ;;  %v255_v35 = vsel %vm190_vm0, %v253_v33, 0.0 }
 0x120   : > { %v256_v36 = vadd.f32 %v255_v35, %v254_v34 }
 0x122   : > { %257 = vadd.xlane.f32.xlu1 %v256_v36 }
 0x195   : > { %v258_v37 = vpop.xlane.xlu1 %257 }
 0x196   : > { %v259_v38 = vmul.f32 %v258_v37, %v248_v27 }
 0x198   : > { %v260_v39 = vadd.f32 1e-05, %v259_v38 }
 0x19a   : > { %418 = vrsqrt.f32 %v260_v39  ;;  %vm267_vm4 = vweird.f32 %v260_v39 }
 0x1a0   : > { %v419_v40 = vpop.eup %418 }
 0x1a1   : > { %v262_v41 = vmul.f32 %v419_v40, %v260_v39  ;;  %vm268_vm3 = vweird.f32 %v419_v40 }
 0x1a2   : > { %vm269_vm5 = vmor %vm267_vm4, %vm268_vm3 }
 0x1a3   : > { %v263_v42 = vmul.f32 %v419_v40, %v262_v41 }
 0x1a5   : > { %v264_v43 = vmul.f32 0.5, %v263_v42 }
 0x1a7   : > { %v265_v44 = vsub.f32 1.5, %v264_v43 }
 0x1a9   : > { %v266_v45 = vmul.f32 %v419_v40, %v265_v44 }
 0x1ab   : > { %v270_v46 = vsel %vm269_vm5, %v419_v40, %v266_v45 }
 0x1ac   : > { %v272_v47 = vmul.f32 %v270_v46, %v251_v31  ;;  %v271_v48 = vmul.f32 %v270_v46, %v250_v30 }
 0x1ae   : > { %v274_v49 = vmax.f32 %v272_v47, 0.0  ;;  %v273_v50 = vmax.f32 %v271_v48, 0.0 }
 0x1b0   : > { %v277_v51 = vrot.slane %v274_v49, 4 }
 0x1b2   : > { %v278_v52 = vsel %vm190_vm0, %v273_v50, %v277_v51 }
 0x1b3   : > { %280 = vst [vmem:[%s163_s17] sm:$0xff] %v278_v52 }
 0x1b4   : > { %447 = shalt.err (!%p444_p3)
}
 0x1b5   : > { %374 = dma.vmem_to_hbm [thread:$0]  (%p544_p5), %s296_s19, 128, %s298_s20, %s282_s16  }
 0x1b6 PF: > { %p380_p4 = scmp.ge.s32.totalorder %s482_s15, 2  ;;  %s309_s4 = sand.u32 1, %s470_s12  }
 0x1b7   : > { %s310_s5 = scalar_lea.sflag [#allocation3], %s309_s4 }
 0x1b8   : > { %p377_p7 = pnand %p380_p4, %p548_p6 }
 0x1ba   : > { %p378_p8 = pneg %p377_p7 }
 0x1bc   : > { %465 = dma.done.wait (%p378_p8), %s310_s5, 128  }
 0x1bd   : > { %467 = vsyncadd (%p378_p8), %s310_s5, 4294967168  ;;  %p13_p9 = scmp.ge.s32.totalorder %s531_s18, 4   ;;  %s610_s12 = smov %s474_s13 }
 0x1be   : > { %s611_s13 = smov %s478_s14  ;;  %s612_s14 = smov %s542_s21 }
 0x1bf   : > { %s613_s15 = smov %s531_s18  ;;  %15 = sbr.rel (!%p13_p9) target bundleno = 3 (0x3), region = 67 }
 0x1c4   :  { %316 = vsyncpa [#allocation3], 1 }
 0x1c5   :  { %318 = vsyncpa [#allocation3 + $0x1], 1 }

</bundles_post_ra>
